<compile_context>
chip_gen: v7x
topology: tpu7x:2x2x1
jax: 0.10.0
libtpu: 0.0.40
codegen_flags: <defaults>
</compile_context>

<pallas_src>
import functools

import jax
import jax.numpy as jnp
import numpy as np
from jax.experimental import pallas as pl
from jax.experimental.pallas import tpu as pltpu


def _round_up(n, m):
    return ((n + m - 1) // m) * m


def mlp_kernel(x_ref, w1_ref, b1_ref, w2_ref, b2_ref, w3_ref, b3_ref, o_ref):
    # layer 1: h = relu(x @ W1 + b1)   (bf16 operands, f32 accumulate)
    h = jnp.dot(x_ref[...], w1_ref[...], preferred_element_type=jnp.float32)
    h = jnp.maximum(h + b1_ref[...], 0.0)          # bias + ReLU in f32 (VPU)
    h = h.astype(w2_ref.dtype)                     # back to bf16 for the MXU

    # layer 2 (hidden): h = relu(h @ W2 + b2)
    h = jnp.dot(h, w2_ref[...], preferred_element_type=jnp.float32)
    h = jnp.maximum(h + b2_ref[...], 0.0)
    h = h.astype(w3_ref.dtype)

    # output layer: o = h @ W3 + b3   (no activation)
    o = jnp.dot(h, w3_ref[...], preferred_element_type=jnp.float32)
    o_ref[...] = (o + b3_ref[...]).astype(o_ref.dtype)


@functools.partial(jax.jit, static_argnames=("tile_b", "compute_dtype"))
def net_forward(x_nchw, params, *, tile_b=512, compute_dtype=jnp.bfloat16):
    """Pallas implementation of Net.forward.

    x_nchw: (B, C, H, W) float32
    params: dict with w1,b1,w2,b2,w3,b3 in (in, out) / (1, out) layout (f32).
    """
    B = x_nchw.shape[0]
    x2d = x_nchw.reshape(B, -1).astype(compute_dtype)   # x.view(B, -1), bf16
    IN = x2d.shape[1]

    # Weights in low precision (feed the MXU), biases stay f32 (added in the
    # f32 accumulator, so no low-precision elementwise path is needed).
    w1 = params["w1"].astype(compute_dtype)
    w2 = params["w2"].astype(compute_dtype)
    w3 = params["w3"].astype(compute_dtype)
    b1 = params["b1"].astype(jnp.float32)
    b2 = params["b2"].astype(jnp.float32)
    b3 = params["b3"].astype(jnp.float32)
    OUT = w3.shape[1]

    # Batch tile: multiple of the sublane pack (16 for bf16, 8 for f32),
    # capped at tile_b so a tile + its double buffer stay tiny in VMEM.
    sublane = 16 if compute_dtype == jnp.bfloat16 else 8
    tb = min(tile_b, _round_up(B, sublane))
    grid = (pl.cdiv(B, tb),)

    x_spec = pl.BlockSpec((tb, IN), lambda i: (i, 0))
    out_spec = pl.BlockSpec((tb, OUT), lambda i: (i, 0))

    def resident(shape):
        # Same block index every grid step -> stays resident in VMEM.
        return pl.BlockSpec(shape, lambda i: (0, 0))

    return pl.pallas_call(
        mlp_kernel,
        out_shape=jax.ShapeDtypeStruct((B, OUT), jnp.float32),
        grid=grid,
        in_specs=[
            x_spec,
            resident(w1.shape), resident(b1.shape),
            resident(w2.shape), resident(b2.shape),
            resident(w3.shape), resident(b3.shape),
        ],
        out_specs=out_spec,
        compiler_params=pltpu.CompilerParams(
            dimension_semantics=("parallel",),   # shard batch tiles over TCs
            vmem_limit_bytes=32 << 20,
        ),
    )(x2d, w1, b1, w2, b2, w3, b3)


def make_params(key, input_size, hidden_sizes, output_size):
    """Deterministic Xavier-uniform init (matches Net.initialize semantics).

    Returns weights transposed to (in, out) and biases as (1, out), f32."""
    sizes = [input_size] + list(hidden_sizes) + [output_size]
    params = {}
    for i, name in enumerate(["1", "2", "3"]):
        fan_in, fan_out = sizes[i], sizes[i + 1]
        key, kw, kb = jax.random.split(key, 3)
        limit = float(np.sqrt(6.0 / (fan_in + fan_out)))
        # PyTorch weight is (out, in); stored transposed (in, out) directly.
        params["w" + name] = jax.random.uniform(
            kw, (fan_in, fan_out), jnp.float32, -limit, limit)
        params["b" + name] = jax.random.uniform(
            kb, (1, fan_out), jnp.float32, -limit, limit)
    return params


def reference_forward(x_nchw, params, compute_dtype=jnp.bfloat16):
    """Pure-JAX reference using the same bf16-operand / f32-accumulate math."""
    x = x_nchw.reshape(x_nchw.shape[0], -1).astype(compute_dtype)
    w1 = params["w1"].astype(compute_dtype)
    w2 = params["w2"].astype(compute_dtype)
    w3 = params["w3"].astype(compute_dtype)
    h = jnp.dot(x, w1, preferred_element_type=jnp.float32) + params["b1"]
    h = jnp.maximum(h, 0.0).astype(compute_dtype)
    h = jnp.dot(h, w2, preferred_element_type=jnp.float32) + params["b2"]
    h = jnp.maximum(h, 0.0).astype(compute_dtype)
    return jnp.dot(h, w3, preferred_element_type=jnp.float32) + params["b3"]


if __name__ == "__main__":
    key = jax.random.PRNGKey(0)
    B, C, H, W = 2, 4, 16, 16          # input x: [2, 4, 16, 16]
    input_size = C * H * W             # 1024
    hidden_sizes = [32, 32]
    output_size = 16

    key, kx, kp = jax.random.split(key, 3)
    x = jax.random.normal(kx, (B, C, H, W), jnp.float32)
    params = make_params(kp, input_size, hidden_sizes, output_size)

    out = net_forward(x, params)
    out = jax.block_until_ready(out)

    ref = reference_forward(x, params)
    np.testing.assert_allclose(np.asarray(out), np.asarray(ref),
                               rtol=1e-3, atol=1e-3)
    print("KERNEL_OK")
</pallas_src>

<mosaic_0001>
module attributes {stable_mosaic.version = 11 : i64} {
  func.func @mlp_kernel(%arg0: i32, %arg1: memref<16x1024xbf16, #tpu.memory_space<vmem>>, %arg2: memref<1024x32xbf16, #tpu.memory_space<vmem>>, %arg3: memref<1x32xf32, #tpu.memory_space<vmem>>, %arg4: memref<32x32xbf16, #tpu.memory_space<vmem>>, %arg5: memref<1x32xf32, #tpu.memory_space<vmem>>, %arg6: memref<32x16xbf16, #tpu.memory_space<vmem>>, %arg7: memref<1x16xf32, #tpu.memory_space<vmem>>, %arg8: memref<16x16xf32, #tpu.memory_space<vmem>>) attributes {dimension_semantics = [#tpu.dimension_semantics<parallel>], iteration_bounds = array<i64: 1>, scalar_prefetch = 0 : i64, scratch_operands = 0 : i64, tpu.core_type = #tpu.core_type<tc>, window_params = [{transform_indices = @transform_0, window_bounds = array<i64: 16, 1024>}, {pipeline_mode = #tpu.pipeline_mode<synchronous>, transform_indices = @transform_1, window_bounds = array<i64: 1024, 32>}, {pipeline_mode = #tpu.pipeline_mode<synchronous>, transform_indices = @transform_2, window_bounds = array<i64: 1, 32>}, {pipeline_mode = #tpu.pipeline_mode<synchronous>, transform_indices = @transform_3, window_bounds = array<i64: 32, 32>}, {pipeline_mode = #tpu.pipeline_mode<synchronous>, transform_indices = @transform_4, window_bounds = array<i64: 1, 32>}, {pipeline_mode = #tpu.pipeline_mode<synchronous>, transform_indices = @transform_5, window_bounds = array<i64: 32, 16>}, {pipeline_mode = #tpu.pipeline_mode<synchronous>, transform_indices = @transform_6, window_bounds = array<i64: 1, 16>}, {transform_indices = @transform_7, window_bounds = array<i64: 16, 16>}]} {
    %c0 = arith.constant 0 : index
    %c0_0 = arith.constant 0 : index
    %0 = vector.load %arg1[%c0, %c0_0] : memref<16x1024xbf16, #tpu.memory_space<vmem>>, vector<16x1024xbf16>
    %c0_1 = arith.constant 0 : index
    %c0_2 = arith.constant 0 : index
    %1 = vector.load %arg2[%c0_1, %c0_2] : memref<1024x32xbf16, #tpu.memory_space<vmem>>, vector<1024x32xbf16>
    %cst = arith.constant dense<0.000000e+00> : vector<16x32xf32>
    %2 = tpu.matmul %0, %1, %cst {dimension_numbers = #tpu.dot_dimension_numbers<[1], [0], [0], [1], [0, 0, 1, 1], [], []>} : vector<16x1024xbf16>, vector<1024x32xbf16>, vector<16x32xf32> -> vector<16x32xf32>
    %c0_3 = arith.constant 0 : index
    %c0_4 = arith.constant 0 : index
    %3 = vector.load %arg3[%c0_3, %c0_4] : memref<1x32xf32, #tpu.memory_space<vmem>>, vector<1x32xf32>
    %4 = vector.broadcast %3 : vector<1x32xf32> to vector<16x32xf32>
    %5 = arith.addf %2, %4 : vector<16x32xf32>
    %cst_5 = arith.constant 0.000000e+00 : f32
    %6 = vector.broadcast %cst_5 : f32 to vector<16x32xf32>
    %7 = arith.maximumf %5, %6 : vector<16x32xf32>
    %8 = arith.truncf %7 : vector<16x32xf32> to vector<16x32xbf16>
    %c0_6 = arith.constant 0 : index
    %c0_7 = arith.constant 0 : index
    %9 = vector.load %arg4[%c0_6, %c0_7] : memref<32x32xbf16, #tpu.memory_space<vmem>>, vector<32x32xbf16>
    %cst_8 = arith.constant dense<0.000000e+00> : vector<16x32xf32>
    %10 = tpu.matmul %8, %9, %cst_8 {dimension_numbers = #tpu.dot_dimension_numbers<[1], [0], [0], [1], [0, 0, 1, 1], [], []>} : vector<16x32xbf16>, vector<32x32xbf16>, vector<16x32xf32> -> vector<16x32xf32>
    %c0_9 = arith.constant 0 : index
    %c0_10 = arith.constant 0 : index
    %11 = vector.load %arg5[%c0_9, %c0_10] : memref<1x32xf32, #tpu.memory_space<vmem>>, vector<1x32xf32>
    %12 = vector.broadcast %11 : vector<1x32xf32> to vector<16x32xf32>
    %13 = arith.addf %10, %12 : vector<16x32xf32>
    %cst_11 = arith.constant 0.000000e+00 : f32
    %14 = vector.broadcast %cst_11 : f32 to vector<16x32xf32>
    %15 = arith.maximumf %13, %14 : vector<16x32xf32>
    %16 = arith.truncf %15 : vector<16x32xf32> to vector<16x32xbf16>
    %c0_12 = arith.constant 0 : index
    %c0_13 = arith.constant 0 : index
    %17 = vector.load %arg6[%c0_12, %c0_13] : memref<32x16xbf16, #tpu.memory_space<vmem>>, vector<32x16xbf16>
    %cst_14 = arith.constant dense<0.000000e+00> : vector<16x16xf32>
    %18 = tpu.matmul %16, %17, %cst_14 {dimension_numbers = #tpu.dot_dimension_numbers<[1], [0], [0], [1], [0, 0, 1, 1], [], []>} : vector<16x32xbf16>, vector<32x16xbf16>, vector<16x16xf32> -> vector<16x16xf32>
    %c0_15 = arith.constant 0 : index
    %c0_16 = arith.constant 0 : index
    %19 = vector.load %arg7[%c0_15, %c0_16] : memref<1x16xf32, #tpu.memory_space<vmem>>, vector<1x16xf32>
    %20 = vector.broadcast %19 : vector<1x16xf32> to vector<16x16xf32>
    %21 = arith.addf %18, %20 : vector<16x16xf32>
    %c0_17 = arith.constant 0 : index
    %c0_18 = arith.constant 0 : index
    %22 = vector.load %arg8[%c0_17, %c0_18] : memref<16x16xf32, #tpu.memory_space<vmem>>, vector<16x16xf32>
    tpu.vector_store %arg8[%c0_17, %c0_18], %21 {strides = array<i32>} : memref<16x16xf32, #tpu.memory_space<vmem>>, vector<16x16xf32>,
    return
  }
  func.func @transform_0(%arg0: i32) -> (i32, i32) {
    %c0_i32 = arith.constant 0 : i32
    %c0_i32_0 = arith.constant 0 : i32
    return %arg0, %c0_i32 : i32, i32
  }
  func.func @transform_1(%arg0: i32) -> (i32, i32) {
    %c0_i32 = arith.constant 0 : i32
    %c0_i32_0 = arith.constant 0 : i32
    %c0_i32_1 = arith.constant 0 : i32
    return %c0_i32, %c0_i32_0 : i32, i32
  }
  func.func @transform_2(%arg0: i32) -> (i32, i32) {
    %c0_i32 = arith.constant 0 : i32
    %c0_i32_0 = arith.constant 0 : i32
    %c0_i32_1 = arith.constant 0 : i32
    return %c0_i32, %c0_i32_0 : i32, i32
  }
  func.func @transform_3(%arg0: i32) -> (i32, i32) {
    %c0_i32 = arith.constant 0 : i32
    %c0_i32_0 = arith.constant 0 : i32
    %c0_i32_1 = arith.constant 0 : i32
    return %c0_i32, %c0_i32_0 : i32, i32
  }
  func.func @transform_4(%arg0: i32) -> (i32, i32) {
    %c0_i32 = arith.constant 0 : i32
    %c0_i32_0 = arith.constant 0 : i32
    %c0_i32_1 = arith.constant 0 : i32
    return %c0_i32, %c0_i32_0 : i32, i32
  }
  func.func @transform_5(%arg0: i32) -> (i32, i32) {
    %c0_i32 = arith.constant 0 : i32
    %c0_i32_0 = arith.constant 0 : i32
    %c0_i32_1 = arith.constant 0 : i32
    return %c0_i32, %c0_i32_0 : i32, i32
  }
  func.func @transform_6(%arg0: i32) -> (i32, i32) {
    %c0_i32 = arith.constant 0 : i32
    %c0_i32_0 = arith.constant 0 : i32
    %c0_i32_1 = arith.constant 0 : i32
    return %c0_i32, %c0_i32_0 : i32, i32
  }
  func.func @transform_7(%arg0: i32) -> (i32, i32) {
    %c0_i32 = arith.constant 0 : i32
    %c0_i32_0 = arith.constant 0 : i32
    return %arg0, %c0_i32 : i32, i32
  }
}

</mosaic_0001>

<bundles_post_ra>
// kernel: net_forward.1
= control target key start
LH: loop header
LB: loop body
LE: loop exit
PB: predicated region body
PF: predicated region fallthrough
CT: control target
= control target key end

     0   :  { %12 = vsyncpa [#allocation3], 0  ;;  %v190_v29 = vlaneseq  ;;  %v1324_v33 = vmov 1966171168   ;;  %vm1326_vm0 = vmmov 0   ;;  %vm897_vm1 = vcmask 261120   ;;  %s1655_s0 = inlined_call_operand.vmem [shape: bf16[2,1024], index: 0, kind: input, shape index: {}]   ;;  %s1656_s1 = inlined_call_operand.vmem [shape: bf16[1024,32], index: 1, kind: input, shape index: {}]   ;;  %s1657_s2 = inlined_call_operand.vmem [shape: f32[1,32], index: 2, kind: input, shape index: {}]   ;;  %s1658_s3 = inlined_call_operand.vmem [shape: bf16[32,32], index: 3, kind: input, shape index: {}]   ;;  %s1659_s4 = inlined_call_operand.vmem [shape: f32[1,32], index: 4, kind: input, shape index: {}]   ;;  %s1660_s5 = inlined_call_operand.vmem [shape: bf16[32,16], index: 5, kind: input, shape index: {}]   ;;  %s1661_s6 = inlined_call_operand.vmem [shape: f32[1,16], index: 6, kind: input, shape index: {}]   ;;  %s1662_s7 = inlined_call_operand.hbm [shape: f32[2,16], index: 7, kind: output, shape index: {}]  }
   0x1   :  { %v1220_v0 = vld [vmem:[%s1656_s1 + $0x40] sm:$0xff]   ;;  %v1224_v4 = vld [vmem:[%s1656_s1 + $0x48] sm:$0xff]   ;;  %v1228_v8 = vld [vmem:[%s1656_s1 + $0x50] sm:$0xff]   ;;  %v188_v34 = vunpack.c.l.s4 %v1324_v33  ;;  %vm1012_vm2 = vcmask 130048  }
   0x2   :  { %v1221_v1 = vld [vmem:[%s1656_s1 + $0xc0] sm:$0xff]   ;;  %1104 = vmatprep.subr.bf16.mxu0 %v1220_v0  ;;  %v1225_v5 = vld [vmem:[%s1656_s1 + $0xc8] sm:$0xff]   ;;  %v1229_v9 = vld [vmem:[%s1656_s1 + $0xd0] sm:$0xff]   ;;  %v191_v35 = vshrl.u32 %v190_v29, 7 }
   0x3   :  { %v1222_v2 = vld [vmem:[%s1656_s1] sm:$0xff]   ;;  %1126 = vmatprep.subr.bf16.mxu1 %v1221_v1  ;;  %v1226_v6 = vld [vmem:[%s1656_s1 + $0x8] sm:$0xff]   ;;  %v1230_v10 = vld [vmem:[%s1656_s1 + $0x10] sm:$0xff]   ;;  %v189_v39 = vunpack.c.0.s8 %v188_v34 }
   0x4   :  { %v1223_v3 = vld [vmem:[%s1656_s1 + $0x80] sm:$0xff]   ;;  %1105 = vmatpush3.bf16.msra.mxu0 %v1222_v2  ;;  %v1227_v7 = vld [vmem:[%s1656_s1 + $0x88] sm:$0xff]   ;;  %v1231_v11 = vld [vmem:[%s1656_s1 + $0x90] sm:$0xff]  }
   0x5   :  { %1127 = vmatpush3.bf16.msra.mxu1 %v1223_v3  ;;  %1106 = vmatprep.subr.bf16.mxu0 %v1224_v4  ;;  %v1232_v12 = vld [vmem:[%s1656_s1 + $0x58] sm:$0xff]   ;;  %v1236_v16 = vld [vmem:[%s1656_s1 + $0x60] sm:$0xff]   ;;  %v1240_v20 = vld [vmem:[%s1656_s1 + $0x68] sm:$0xff]   ;;  %v1490_v45 = vsub.s32 %v189_v39, %v191_v35 }
   0x6   :  { %1128 = vmatprep.subr.bf16.mxu1 %v1225_v5  ;;  %v1233_v13 = vld [vmem:[%s1656_s1 + $0xd8] sm:$0xff]   ;;  %v1237_v17 = vld [vmem:[%s1656_s1 + $0xe0] sm:$0xff]   ;;  %v1241_v21 = vld [vmem:[%s1656_s1 + $0xe8] sm:$0xff]  }
   0x7   :  { %v1234_v14 = vld [vmem:[%s1656_s1 + $0x18] sm:$0xff]   ;;  %v1238_v18 = vld [vmem:[%s1656_s1 + $0x20] sm:$0xff]   ;;  %v1242_v22 = vld [vmem:[%s1656_s1 + $0x28] sm:$0xff]  }
   0x8   :  { %1107 = vmatpush3.bf16.msra.mxu0 %v1226_v6  ;;  %v1235_v15 = vld [vmem:[%s1656_s1 + $0x98] sm:$0xff]   ;;  %v1239_v19 = vld [vmem:[%s1656_s1 + $0xa0] sm:$0xff]   ;;  %v1243_v23 = vld [vmem:[%s1656_s1 + $0xa8] sm:$0xff]  }
   0x9   :  { %1129 = vmatpush3.bf16.msra.mxu1 %v1227_v7  ;;  %1108 = vmatprep.subr.bf16.mxu0 %v1228_v8  ;;  %v1244_v24 = vld [vmem:[%s1656_s1 + $0x70] sm:$0xff]   ;;  %v1248_v28 = vld [vmem:[%s1656_s1 + $0x78] sm:$0xff]   ;;  %v1252_v36 = vld [vmem:[%s1655_s0] ss:$8 sps:$4 sm:$0xff]  }
   0xa   :  { %1130 = vmatprep.subr.bf16.mxu1 %v1229_v9  ;;  %v1245_v25 = vld [vmem:[%s1656_s1 + $0xf0] sm:$0xff]   ;;  %v1249_v30 = vld [vmem:[%s1656_s1 + $0xf8] sm:$0xff]   ;;  %v1254_v37 = vld [vmem:[%s1655_s0 + $0x4] ss:$8 sps:$4 sm:$0xff]   ;;  %v193_v47 = vrot.slane %v1252_v36, %v1490_v45 }
   0xb   :  { %v1246_v26 = vld [vmem:[%s1656_s1 + $0x30] sm:$0xff]   ;;  %v1250_v31 = vld [vmem:[%s1656_s1 + $0x38] sm:$0xff]   ;;  %v1258_v41 = vld [vmem:[%s1655_s0 + $0x20] ss:$8 sps:$4 sm:$0xff]   ;;  %v1503_v52 = vrot.slane %v1254_v37, %v1490_v45 }
   0xc   :  { %1109 = vmatpush3.bf16.msra.mxu0 %v1230_v10  ;;  %v1247_v27 = vld [vmem:[%s1656_s1 + $0xb0] sm:$0xff]   ;;  %v1251_v32 = vld [vmem:[%s1656_s1 + $0xb8] sm:$0xff]   ;;  %v1260_v42 = vld [vmem:[%s1655_s0 + $0x24] ss:$8 sps:$4 sm:$0xff]   ;;  %v221_v49 = vrot.slane %v1258_v41, %v1490_v45 }
   0xd   :  { %1131 = vmatpush3.bf16.msra.mxu1 %v1231_v11  ;;  %1110 = vmatprep.subr.bf16.mxu0 %v1232_v12  ;;  %v1255_v38 = vld [vmem:[%s1655_s0 + $0x10] ss:$8 sps:$4 sm:$0xff]   ;;  %v1257_v40 = vld [vmem:[%s1655_s0 + $0x14] ss:$8 sps:$4 sm:$0xff]   ;;  %v1264_v46 = vld [vmem:[%s1656_s1 + $0x140] sm:$0xff]   ;;  %v1509_v54 = vrot.slane %v1260_v42, %v1490_v45 }
   0xe   :  { %1132 = vmatprep.subr.bf16.mxu1 %v1233_v13  ;;  %v1261_v43 = vld [vmem:[%s1655_s0 + $0x30] ss:$8 sps:$4 sm:$0xff]   ;;  %v1263_v44 = vld [vmem:[%s1655_s0 + $0x34] ss:$8 sps:$4 sm:$0xff]   ;;  %v207_v48 = vrot.slane %v1255_v38, %v1490_v45  ;;  %v1265_v51 = vld [vmem:[%s1656_s1 + $0x1c0] sm:$0xff]   ;;  %v1506_v53 = vrot.slane %v1257_v40, %v1490_v45 }
   0xf   :  { %v235_v50 = vrot.slane %v1261_v43, %v1490_v45  ;;  %v1512_v55 = vrot.slane %v1263_v44, %v1490_v45  ;;  %v1266_v2 = vld [vmem:[%s1656_s1 + $0x100] sm:$0xff]   ;;  %v1268_v10 = vld [vmem:[%s1656_s1 + $0x148] sm:$0xff]   ;;  %v1289_v33 = vld [vmem:[%s1656_s1 + $0x1f0] sm:$0xff]  }
  0x10   :  { %1111 = vmatpush3.bf16.msra.mxu0 %v1234_v14  ;;  %v244_v56 = vcombine.high %v193_v47, %v207_v48  ;;  %v243_v58 = vcombine.low %v193_v47, %v207_v48  ;;  %v246_v60 = vcombine.high %v1503_v52, %v1506_v53  ;;  %v1267_v3 = vld [vmem:[%s1656_s1 + $0x180] sm:$0xff]   ;;  %v1269_v11 = vld [vmem:[%s1656_s1 + $0x1c8] sm:$0xff]   ;;  %v1290_v34 = vld [vmem:[%s1656_s1 + $0x130] sm:$0xff]   ;;  %v245_v37 = vcombine.low %v1503_v52, %v1506_v53 }
  0x11   :  { %1133 = vmatpush3.bf16.msra.mxu1 %v1235_v15  ;;  %1112 = vmatprep.subr.bf16.mxu0 %v1236_v16  ;;  %v248_v57 = vcombine.high %v221_v49, %v235_v50  ;;  %v247_v59 = vcombine.low %v221_v49, %v235_v50  ;;  %v250_v61 = vcombine.high %v1509_v54, %v1512_v55  ;;  %v1270_v12 = vld [vmem:[%s1656_s1 + $0x108] sm:$0xff]   ;;  %v1272_v16 = vld [vmem:[%s1656_s1 + $0x150] sm:$0xff]   ;;  %v1292_v36 = vld [vmem:[%s1656_s1 + $0x178] sm:$0xff]   ;;  %v1325_v47 = vmov 0.0  }
  0x12   :  { %1134 = vmatprep.subr.bf16.mxu1 %v1237_v17  ;;  %v271_v62 = vrot.slane %v244_v56, %v1490_v45  ;;  %v257_v0 = vrot.slane %v243_v58, %v1490_v45  ;;  %v278_v4 = vrot.slane %v246_v60, %v1490_v45  ;;  %v1271_v15 = vld [vmem:[%s1656_s1 + $0x188] sm:$0xff]   ;;  %v1273_v17 = vld [vmem:[%s1656_s1 + $0x1d0] sm:$0xff]   ;;  %v249_v38 = vcombine.low %v1509_v54, %v1512_v55  ;;  %v1293_v39 = vld [vmem:[%s1656_s1 + $0x1f8] sm:$0xff]  }
  0x13   :  { %v299_v63 = vrot.slane %v248_v57, %v1490_v45  ;;  %v285_v1 = vrot.slane %v247_v59, %v1490_v45  ;;  %v306_v5 = vrot.slane %v250_v61, %v1490_v45  ;;  %v1285_v29 = vld [vmem:[%s1656_s1 + $0x1e8] sm:$0xff]   ;;  %v1291_v35 = vld [vmem:[%s1656_s1 + $0x1b0] sm:$0xff]   ;;  %v264_v40 = vrot.slane %v245_v37, %v1490_v45  ;;  %v1294_v42 = vld [vmem:[%s1656_s1 + $0x138] sm:$0xff]  }
  0x14   :  { %1113 = vmatpush3.bf16.msra.mxu0 %v1238_v18  ;;  %v1274_v18 = vld [vmem:[%s1656_s1 + $0x110] sm:$0xff]   ;;  %v292_v41 = vrot.slane %v249_v38, %v1490_v45  ;;  %v1295_v43 = vld [vmem:[%s1656_s1 + $0x1b8] sm:$0xff]   ;;  %v1296_v45 = vld [vmem:[%s1658_s3] sm:$0xff]  }
  0x15   :  { %1135 = vmatpush3.bf16.msra.mxu1 %v1239_v19  ;;  %1114 = vmatprep.subr.bf16.mxu0 %v1240_v20  ;;  %v311_v6 = vcombine.low %v271_v62, %v299_v63  ;;  %v312_v7 = vcombine.high %v271_v62, %v299_v63  ;;  %v307_v8 = vcombine.low %v257_v0, %v285_v1  ;;  %v1275_v19 = vld [vmem:[%s1656_s1 + $0x190] sm:$0xff]   ;;  %v1276_v20 = vld [vmem:[%s1656_s1 + $0x158] sm:$0xff]   ;;  %v1297_v48 = vld [vmem:[%s1658_s3 + $0x8] sm:$0xff]  }
  0x16   :  { %1136 = vmatprep.subr.bf16.mxu1 %v1241_v21  ;;  %v308_v9 = vcombine.high %v257_v0, %v285_v1  ;;  %v313_v13 = vcombine.low %v278_v4, %v306_v5  ;;  %v314_v14 = vcombine.high %v278_v4, %v306_v5  ;;  %v1277_v21 = vld [vmem:[%s1656_s1 + $0x1d8] sm:$0xff]   ;;  %v309_v44 = vcombine.low %v264_v40, %v292_v41 }
  0x17   :  { %739 = vmatprep.mubr.bf16.mxu0 %v311_v6  ;;  %780 = vmatprep.mubr.bf16.mxu1 %v312_v7 }
  0x18   :  { %1115 = vmatpush3.bf16.msra.mxu0 %v1242_v22  ;;  %v1278_v22 = vld [vmem:[%s1656_s1 + $0x118] sm:$0xff]  }
  0x19   :  { %1137 = vmatpush3.bf16.msra.mxu1 %v1243_v23  ;;  %1116 = vmatprep.subr.bf16.mxu0 %v1244_v24  ;;  %v1279_v23 = vld [vmem:[%s1656_s1 + $0x198] sm:$0xff]   ;;  %v1280_v24 = vld [vmem:[%s1656_s1 + $0x160] sm:$0xff]  }
  0x1a   :  { %1138 = vmatprep.subr.bf16.mxu1 %v1245_v25  ;;  %v1281_v25 = vld [vmem:[%s1656_s1 + $0x1e0] sm:$0xff]  }
  0x1c   :  { %1117 = vmatpush3.bf16.msra.mxu0 %v1246_v26  ;;  %v1282_v26 = vld [vmem:[%s1656_s1 + $0x120] sm:$0xff]  }
  0x1d   :  { %1139 = vmatpush3.bf16.msra.mxu1 %v1247_v27  ;;  %1118 = vmatprep.subr.bf16.mxu0 %v1248_v28  ;;  %v1283_v27 = vld [vmem:[%s1656_s1 + $0x1a0] sm:$0xff]   ;;  %v1284_v28 = vld [vmem:[%s1656_s1 + $0x168] sm:$0xff]  }
  0x1e   :  { %1140 = vmatprep.subr.bf16.mxu1 %v1249_v30  ;;  %v1286_v30 = vld [vmem:[%s1656_s1 + $0x128] sm:$0xff]  }
  0x20   :  { %1119 = vmatpush3.bf16.msra.mxu0 %v1250_v31  ;;  %v1287_v31 = vld [vmem:[%s1656_s1 + $0x1a8] sm:$0xff]  }
  0x21   :  { %1141 = vmatpush3.bf16.msra.mxu1 %v1251_v32  ;;  %1148 = vmatprep.subr.bf16.mxu0 %v1264_v46  ;;  %v1288_v32 = vld [vmem:[%s1656_s1 + $0x170] sm:$0xff]   ;;  %v310_v46 = vcombine.high %v264_v40, %v292_v41 }
  0x22   :  { %1170 = vmatprep.subr.bf16.mxu1 %v1265_v51  ;;  %v1031_v51 = vld [vmem:[%s1657_s2] ss:$0 sm:$0xff] }
  0x23   :  { %740 = vmatmul.mubr.bf16.vlgmr.msra.gmra.mrb[0].mxu0 %v307_v8 }
  0x24   :  { %781 = vmatmul.mubr.bf16.vlgmr.msra.gmra.mrb[0].mxu1 %v308_v9  ;;  %1149 = vmatpush3.bf16.msra.mxu0 %v1266_v2 }
  0x25   :  { %1171 = vmatpush3.bf16.msra.mxu1 %v1267_v3  ;;  %1150 = vmatprep.subr.bf16.mxu0 %v1268_v10 }
  0x26   :  { %1172 = vmatprep.subr.bf16.mxu1 %v1269_v11  ;;  %821 = vmatprep.mubr.bf16.mxu0 %v313_v13 }
  0x27   :  { %862 = vmatprep.mubr.bf16.mxu1 %v314_v14 }
  0x28   :  { %1151 = vmatpush3.bf16.msra.mxu0 %v1270_v12 }
  0x29   :  { %1173 = vmatpush3.bf16.msra.mxu1 %v1271_v15  ;;  %1152 = vmatprep.subr.bf16.mxu0 %v1272_v16 }
  0x2a   :  { %1174 = vmatprep.subr.bf16.mxu1 %v1273_v17 }
  0x2c   :  { %1153 = vmatpush3.bf16.msra.mxu0 %v1274_v18 }
  0x2d   :  { %1175 = vmatpush3.bf16.msra.mxu1 %v1275_v19  ;;  %1154 = vmatprep.subr.bf16.mxu0 %v1276_v20 }
  0x2e   :  { %1176 = vmatprep.subr.bf16.mxu1 %v1277_v21  ;;  %v1298_v21 = vld [vmem:[%s1660_s5] sm:$0xff]  }
  0x30   :  { %1155 = vmatpush3.bf16.msra.mxu0 %v1278_v22  ;;  %v1299_v22 = vld [vmem:[%s1660_s5 + $0x8] sm:$0xff]  }
  0x31   :  { %1177 = vmatpush3.bf16.msra.mxu1 %v1279_v23  ;;  %1156 = vmatprep.subr.bf16.mxu0 %v1280_v24  ;;  %v1096_v23 = vld [vmem:[%s1659_s4] ss:$0 sm:$0xff] }
  0x32   :  { %1178 = vmatprep.subr.bf16.mxu1 %v1281_v25 }
  0x34   :  { %1157 = vmatpush3.bf16.msra.mxu0 %v1282_v26 }
  0x35   :  { %1179 = vmatpush3.bf16.msra.mxu1 %v1283_v27  ;;  %1158 = vmatprep.subr.bf16.mxu0 %v1284_v28 }
  0x36   :  { %1180 = vmatprep.subr.bf16.mxu1 %v1285_v29 }
  0x38   :  { %1159 = vmatpush3.bf16.msra.mxu0 %v1286_v30 }
  0x39   :  { %1181 = vmatpush3.bf16.msra.mxu1 %v1287_v31  ;;  %1160 = vmatprep.subr.bf16.mxu0 %v1288_v32 }
  0x3a   :  { %1182 = vmatprep.subr.bf16.mxu1 %v1289_v33  ;;  %v1100_v33 = vld [vmem:[%s1661_s6] ss:$0 sm:$0xff] }
  0x3c   :  { %1161 = vmatpush3.bf16.msra.mxu0 %v1290_v34 }
  0x3d   :  { %1183 = vmatpush3.bf16.msra.mxu1 %v1291_v35  ;;  %1162 = vmatprep.subr.bf16.mxu0 %v1292_v36 }
  0x3e   :  { %1184 = vmatprep.subr.bf16.mxu1 %v1293_v39 }
  0x40   :  { %1163 = vmatpush3.bf16.msra.mxu0 %v1294_v42 }
  0x41   :  { %1185 = vmatpush3.bf16.msra.mxu1 %v1295_v43  ;;  %1198 = vmatprep.subr.bf16.mxu0 %v1325_v47 }
  0x42   :  { %1206 = vmatprep.subr.bf16.mxu1 %v1325_v47 }
  0x43   :  { %822 = vmatmul.mubr.bf16.vlgmr.msra.gmra.mrb[4].mxu0 %v309_v44 }
  0x44   :  { %863 = vmatmul.mubr.bf16.vlgmr.msra.gmra.mrb[4].mxu1 %v310_v46  ;;  %1199 = vmatpush3.bf16.msra.mxu0 %v1296_v45 }
  0x45   :  { %1200 = vmatprep.subr.bf16.mxu0 %v1325_v47  ;;  %1202 = vmatprep.mubr.msk.bf16.mxu0 %vm1326_vm0, %v1325_v47 }
  0x46   :  { %1210 = vmatprep.mubr.msk.bf16.mxu1 %vm1326_vm0, %v1325_v47  ;;  %1207 = vmatpush3.bf16.msra.mxu1 %v1298_v21 }
  0x47   :  { %1208 = vmatprep.subr.bf16.mxu1 %v1325_v47 }
  0x48   :  { %1201 = vmatpush3.bf16.msra.mxu0 %v1297_v48 }
  0x4a   :  { %1209 = vmatpush3.bf16.msra.mxu1 %v1299_v22 }
  0xf6   :  { %v1120_v49 = vpop.f32.mrb[0].mxu0 }
  0xf7   :  { %v1142_v50 = vpop.f32.mrb[0].mxu1  ;;  %v1121_v52 = vpop.f32.mrb[1].mxu0 }
  0xf8   :  { %v1143_v53 = vpop.f32.mrb[1].mxu1  ;;  %v1122_v54 = vadd.f32 %v1121_v52, %v1120_v49  ;;  %v1123_v56 = vpop.f32.mrb[2].mxu0 }
  0xf9   :  { %v1144_v55 = vadd.f32 %v1143_v53, %v1142_v50  ;;  %v1145_v57 = vpop.f32.mrb[2].mxu1  ;;  %v1124_v58 = vpop.f32.mrb[3].mxu0 }
  0xfa   :  { %v1146_v59 = vpop.f32.mrb[3].mxu1  ;;  %v742_v60 = vadd.f32 %v1122_v54, %v1031_v51  ;;  %v1125_v61 = vadd.f32 %v1124_v58, %v1123_v56 }
  0xfb   :  { %v1147_v62 = vadd.f32 %v1146_v59, %v1145_v57 }
  0xfc   :  { %v783_v63 = vadd.f32 %v1144_v55, %v742_v60  ;;  %v745_v0 = vadd.f32 %v1125_v61, %v1031_v51 }
  0xfe   :  { %v786_v1 = vadd.f32 %v1147_v62, %v745_v0 }
 0x116   :  { %v1164_v2 = vpop.f32.mrb[4].mxu0 }
 0x117   :  { %v1186_v3 = vpop.f32.mrb[4].mxu1  ;;  %v1165_v4 = vpop.f32.mrb[5].mxu0 }
 0x118   :  { %v1187_v5 = vpop.f32.mrb[5].mxu1  ;;  %v1166_v6 = vadd.f32 %v1165_v4, %v1164_v2  ;;  %v1167_v8 = vpop.f32.mrb[6].mxu0 }
 0x119   :  { %v1188_v7 = vadd.f32 %v1187_v5, %v1186_v3  ;;  %v1189_v9 = vpop.f32.mrb[6].mxu1  ;;  %v1168_v10 = vpop.f32.mrb[7].mxu0 }
 0x11a   :  { %v1190_v11 = vpop.f32.mrb[7].mxu1  ;;  %v824_v12 = vadd.f32 %v1166_v6, %v783_v63  ;;  %v1169_v13 = vadd.f32 %v1168_v10, %v1167_v8 }
 0x11b   :  { %v1191_v14 = vadd.f32 %v1190_v11, %v1189_v9 }
 0x11c   :  { %v865_v15 = vadd.f32 %v1188_v7, %v824_v12  ;;  %v827_v16 = vadd.f32 %v1169_v13, %v786_v1 }
 0x11e   :  { %v868_v17 = vadd.f32 %v1191_v14, %v827_v16  ;;  %v871_v18 = vmax.f32 %v865_v15, 0.0 }
 0x120   :  { %v872_v19 = vmax.f32 %v868_v17, 0.0 }
 0x122   :  { %v873_v20 = vpack.c.bf16 %v872_v19, %v871_v18 }
 0x124   :  { %1203 = vmatmul.mubr.msk.bf16.vlgmr.msra.gmra.mrb[8].mxu0 %vm897_vm1, %v873_v20 }
 0x1f7   :  { %v935_v24 = vpop.f32.mrb[8].mxu0 }
 0x1f8   :  { %v936_v25 = vadd.f32 %v1096_v23, %v935_v24  ;;  %v1204_v26 = vpop.f32.mrb[9].mxu0 }
 0x1f9   :  { %v938_v27 = vpop.f32.mrb[10].mxu0 }
 0x1fa   :  { %v939_v28 = vadd.f32 %v1096_v23, %v938_v27  ;;  %v1205_v29 = vpop.f32.mrb[11].mxu0  ;;  %v942_v30 = vmax.f32 %v936_v25, 0.0 }
 0x1fc   :  { %v943_v31 = vmax.f32 %v939_v28, 0.0 }
 0x1fe   :  { %v944_v32 = vpack.c.bf16 %v943_v31, %v942_v30 }
 0x200   :  { %1211 = vmatmul.mubr.msk.bf16.vlgmr.msra.gmra.mrb[8].mxu1 %vm897_vm1, %v944_v32 }
 0x2d3   :  { %v1005_v34 = vpop.f32.mrb[8].mxu1 }
 0x2d4   :  { %v1006_v35 = vadd.f32 %v1100_v33, %v1005_v34  ;;  %v1212_v36 = vpop.f32.mrb[9].mxu1 }
 0x2d5   :  { %v1008_v37 = vpop.f32.mrb[10].mxu1 }
 0x2d6   :  { %1013 = vst.msk [vmem:[#allocation2] sm:$0xff] %vm1012_vm2, %v1006_v35  ;;  %v1009_v38 = vadd.f32 %v1100_v33, %v1008_v37  ;;  %v1213_v39 = vpop.f32.mrb[11].mxu1 }
 0x2d8   :  { %1014 = vst.msk [vmem:[#allocation2 + $0x8] sm:$0xff] %vm1012_vm2, %v1009_v38 }
 0x2d9   :  { %1019 = vsyncadd [#allocation3], 224  ;;  %s1327_s4 = smov [#allocation2]  }
 0x2da   :  { %s1020_s5 = sshll.u32 %s1327_s4, 4  ;;  %s1021_s5 = int_to_ptr.vmem [resolvable:$true] %s1020_s5 }
 0x2db   :  { %s1300_s15 = scalar_lea.vmem %s1021_s5, 32  ;;  %s1304_s0 = scalar_lea.vmem %s1021_s5, 256 }
 0x2dc   :  { %p1301_p0 = scmp.ne.s32.totalorder %s1021_s5, %s1300_s15  ;;  %p1305_p1 = scmp.lt.s32.totalorder %s1021_s5, %s1021_s5 }
 0x2dd   :  { %p1306_p2 = scmp.lt.s32.totalorder %s1304_s0, %s1300_s15 }
 0x2df   :  { %p1307_p3 = por %p1306_p2, %p1305_p1 }
 0x2e1   :  { %p1308_p4 = pnand %p1307_p3, %p1301_p0 }
 0x2e3   :  { %1311 = shalt.err (!%p1308_p4)
}
 0x2e4   :  { %s1312_s17 = scalar_lea.hbm %s1662_s7, 32 }
 0x2e5   :  { %p1313_p5 = scmp.ne.s32.totalorder %s1662_s7, %s1312_s17  ;;  %p1316_p6 = scmp.lt.u32.totalorder %s1312_s17, %s1662_s7 }
 0x2e7   :  { %p1318_p7 = pnand %p1316_p6, %p1313_p5 }
 0x2e9   :  { %1321 = shalt.err (!%p1318_p7)
}
 0x2ea   :  { %s1328_s22 = smov 32   ;;  %s1329_s23 = smov 2  }
 0x2eb   :  { %1026 = dma.vmem_to_hbm [thread:$0]  %s1021_s5, 32, %s1662_s7, [#allocation3], %s1328_s22, %s1328_s22, %s1329_s23  }
 0x2ec   :  { %1322 = dma.done.wait [#allocation3], 256  }
 0x2ed   :  { %1323 = vsyncadd [#allocation3], 4294967040 }
 0x2ee   :  { %1030 = vsyncpa [#allocation3], 1 }

</bundles_post_ra>
